<compile_context>
chip_gen: v7x
topology: tpu7x:2x2x1
jax: 0.10.0
libtpu: 0.0.40
codegen_flags: <defaults>
</compile_context>

<pallas_src>
import jax
import jax.numpy as jnp
from jax import lax
from jax.experimental import pallas as pl
from jax.experimental.pallas import tpu as pltpu


def _round_up(x, m):
    return (x + m - 1) // m * m


# --------------------------------------------------------------------------
# Kernel body: one (batch-block, tgt-block) per grid step.
# --------------------------------------------------------------------------
def _attn_kernel(src_ref, mem_ref, bias_ref, out_ref):
    """
    src_ref  : VMEM (TB, TT, D)
    mem_ref  : VMEM (TB, S,  D)   (block index constant over the tgt axis,
                                   so Pallas does not re-DMA it per tgt tile)
    bias_ref : VMEM (TB, 1,  S)   additive mask: 0 = valid, -inf = masked
    out_ref  : VMEM (TB, TT, S)   log-softmax alignments
    """
    q = src_ref[...]                       # (TB, TT, D)
    k = mem_ref[...]                       # (TB, S, D)

    # Batched NT contraction straight on the MXU (no explicit transpose),
    # accumulating in f32.
    scores = lax.dot_general(
        q, k,
        dimension_numbers=(((2,), (2,)), ((0,), (0,))),
        preferred_element_type=jnp.float32)          # (TB, TT, S)

    # Length mask (precomputed in the wrapper; broadcasts over tgt rows).
    scores = scores + bias_ref[...]

    # Numerically stable log_softmax over the src axis (exp/log on the EUP).
    m = jnp.max(scores, axis=-1, keepdims=True)
    lse = m + jnp.log(jnp.sum(jnp.exp(scores - m), axis=-1, keepdims=True))
    out_ref[...] = (scores - lse).astype(out_ref.dtype)


# --------------------------------------------------------------------------
# Tiling helpers
# --------------------------------------------------------------------------
def _device_vmem_bytes():
    """Physical VMEM of the attached TPU; conservative 64 MiB fallback."""
    try:
        info = pltpu.get_tpu_info()
        cap = getattr(info, "vmem_capacity_bytes", None)
        if cap:
            return int(cap)
    except Exception:
        pass
    return 64 * 1024 * 1024


def _select_tgt_tile(tgt_len):
    """Pick (tt, t_pad) minimizing row padding while keeping big tiles."""
    if tgt_len <= 256:
        tt = max(8, _round_up(tgt_len, 8))
        return tt, tt
    best_tt, best_pad = None, None
    for tt in (256, 128, 64):
        t_pad = _round_up(tgt_len, tt)
        waste = t_pad - tgt_len
        if waste <= 0.05 * tgt_len:       # big tile with negligible padding
            return tt, t_pad
        if best_pad is None or t_pad < best_pad:
            best_tt, best_pad = tt, t_pad
    return best_tt, best_pad


def _select_batch_tile(batch, tt, s_w, dim, in_ib, out_ib,
                       vmem_budget, out_buffers):
    """Largest batch tile whose full VMEM footprint (inputs/outputs
    double-buffered + the in-kernel f32 scores temporaries) fits the budget."""
    d_l = _round_up(dim, 128)          # lane padding of the contraction dim
    s_l = _round_up(s_w, 128)          # lane padding of the src dim in VMEM
    s_sub = _round_up(s_w, 8)

    src_bytes = tt * d_l * in_ib
    mem_bytes = s_sub * d_l * in_ib
    bias_bytes = 8 * s_l * 4           # (1, S) block pads to 8 sublanes
    out_bytes = tt * s_l * out_ib
    scr_bytes = tt * s_l * 4           # f32 scores (+ exp temp, counted x2)

    def vmem_need(tb):
        return tb * (2 * (src_bytes + mem_bytes + bias_bytes)
                     + out_buffers * out_bytes
                     + 2 * scr_bytes)

    def io_bytes(tb):
        return tb * (src_bytes + mem_bytes + bias_bytes + out_bytes)

    io_cap = max(2 << 20, vmem_budget // 12)   # ~4 MiB on v7x, ~8 MiB on v6e
    hard_cap = int(0.85 * vmem_budget)

    tb_cap = 1
    for tb in range(batch, 0, -1):
        if vmem_need(tb) <= hard_cap and io_bytes(tb) <= io_cap:
            tb_cap = tb
            break
    # TODO(synk): if even tb=1 exceeds the budget (huge tgt*src*dim), tile the
    # src axis with an 'arbitrary' reduction axis + online log-sum-exp.

    # Prefer an exact divisor of batch (no batch-pad copy) if it is within 2x
    # of the cap; otherwise pad batch up to a multiple of tb_cap.
    divisors = [d for d in range(1, batch + 1)
                if batch % d == 0 and d <= tb_cap]
    tb_div = max(divisors)
    tb = tb_div if 2 * tb_div >= tb_cap else tb_cap
    return tb, vmem_need(tb)


# --------------------------------------------------------------------------
# Public wrapper
# --------------------------------------------------------------------------
def paragraph_plan_selection_attention(source, memory_bank, memory_lengths=None,
                                       *, use_bf16_matmul=True,
                                       out_dtype=jnp.float32):
    """JAX/Pallas equivalent of ParagraphPlanSelectionAttention.forward.

    use_bf16_matmul: cast matmul inputs to bf16 (f32 MXU accumulation kept).
                     Halves input HBM traffic and uses the full-rate MXU path.
    out_dtype:       jnp.float32 matches PyTorch; jnp.bfloat16 halves the
                     dominant output HBM write (fast path).
    """
    batch, tgt_len, dim = source.shape
    batch_m, src_len, dim_m = memory_bank.shape
    assert batch == batch_m and dim == dim_m

    s_w = src_len                          # src axis never padded
    tt, t_pad = _select_tgt_tile(tgt_len)

    if memory_lengths is None:
        lengths = jnp.full((batch,), src_len, dtype=jnp.int32)
    else:
        lengths = jnp.minimum(memory_lengths.astype(jnp.int32), src_len)

    # Additive mask bias: 0 on valid columns, -inf on masked columns.
    col = jnp.arange(s_w, dtype=jnp.int32)[None, :]
    bias = jnp.where(col < lengths[:, None], 0.0, -jnp.inf).astype(jnp.float32)
    bias = bias[:, None, :]                                    # (batch, 1, S)

    in_dtype = jnp.bfloat16 if use_bf16_matmul else source.dtype
    src = source.astype(in_dtype)
    mem = memory_bank.astype(in_dtype)
    if t_pad != tgt_len:
        src = jnp.pad(src, ((0, 0), (0, t_pad - tgt_len), (0, 0)))

    # ---- device-aware VMEM budget ----
    device_vmem = _device_vmem_bytes()
    headroom = max(16 << 20, device_vmem // 4)       # 16 MiB (v7x) / 32 MiB
    vmem_budget = min(device_vmem - (8 << 20),
                      max(32 << 20, device_vmem - headroom))

    out_buffers = 3 if device_vmem >= 100 * 1024 * 1024 else 2

    in_ib = jnp.dtype(in_dtype).itemsize
    out_ib = jnp.dtype(out_dtype).itemsize
    tb, vmem_need = _select_batch_tile(batch, tt, s_w, dim, in_ib, out_ib,
                                       vmem_budget, out_buffers)

    b_pad = _round_up(batch, tb)
    if b_pad != batch:
        src = jnp.pad(src, ((0, b_pad - batch), (0, 0), (0, 0)))
        mem = jnp.pad(mem, ((0, b_pad - batch), (0, 0), (0, 0)))
        bias = jnp.pad(bias, ((0, b_pad - batch), (0, 0), (0, 0)))

    num_b = b_pad // tb
    num_t = t_pad // tt

    # Output spec: deeper write-back pipelining only where VMEM is plentiful
    # (v5e/v6e, 128 MiB) and the grid is long enough to benefit.
    out_spec = pl.BlockSpec((tb, tt, s_w), lambda b, t: (b, t, 0))
    if out_buffers == 3 and num_b * num_t >= 3:
        try:
            out_spec = pl.BlockSpec((tb, tt, s_w), lambda b, t: (b, t, 0),
                                    pipeline_mode=pl.Buffered(3))
        except Exception:
            out_spec = pl.BlockSpec((tb, tt, s_w), lambda b, t: (b, t, 0))

    grid_spec = pltpu.PrefetchScalarGridSpec(
        num_scalar_prefetch=0,
        grid=(num_b, num_t),
        in_specs=[
            pl.BlockSpec((tb, tt, dim), lambda b, t: (b, t, 0)),
            pl.BlockSpec((tb, s_w, dim), lambda b, t: (b, 0, 0)),
            pl.BlockSpec((tb, 1, s_w), lambda b, t: (b, 0, 0)),
        ],
        out_specs=out_spec,
    )

    # Megacore (v7x): split on the batch axis so both cores don't re-DMA the
    # same memory_bank block; only split on tgt when there is a single
    # batch block.
    if num_b >= 2:
        dim_sem = ("parallel", "arbitrary")
    else:
        dim_sem = ("arbitrary", "parallel")

    out = pl.pallas_call(
        _attn_kernel,
        out_shape=jax.ShapeDtypeStruct((b_pad, t_pad, s_w), out_dtype),
        grid_spec=grid_spec,
        compiler_params=pltpu.CompilerParams(
            dimension_semantics=dim_sem,
            vmem_limit_bytes=int(vmem_budget)),
    )(src, mem, bias)

    if b_pad != batch or t_pad != tgt_len:
        out = out[:batch, :tgt_len, :]
    return out


# --------------------------------------------------------------------------
# Pure-JAX reference mirroring the PyTorch forward
# --------------------------------------------------------------------------
def _reference(source, memory_bank, memory_lengths):
    align = jnp.einsum("btd,bsd->bts", source, memory_bank)
    if memory_lengths is not None:
        src_len = memory_bank.shape[1]
        mask = jnp.arange(src_len)[None, :] < memory_lengths[:, None]
        align = jnp.where(mask[:, None, :], align, -jnp.inf)
    return jax.nn.log_softmax(align, axis=-1)


if __name__ == "__main__":
    key = jax.random.PRNGKey(0)
    batch, tgt_len, src_len, dim = 2, 8, 16, 32

    k1, k2 = jax.random.split(key)
    source = jax.random.normal(k1, (batch, tgt_len, dim), dtype=jnp.float32)
    memory_bank = jax.random.normal(k2, (batch, src_len, dim), dtype=jnp.float32)
    memory_lengths = jnp.array([16, 11], dtype=jnp.int32)

    def check(out, ref, atol):
        assert out.shape == ref.shape
        finite = jnp.isfinite(ref)
        assert bool(jnp.all(jnp.isneginf(out) == jnp.isneginf(ref)))
        assert bool(jnp.allclose(jnp.where(finite, out, 0.0),
                                 jnp.where(finite, ref, 0.0),
                                 atol=atol, rtol=atol))

    # --- f32 matmul path, masked: tight tolerance vs f32 reference ---
    out_f32 = jax.block_until_ready(
        paragraph_plan_selection_attention(source, memory_bank, memory_lengths,
                                           use_bf16_matmul=False))
    check(out_f32, _reference(source, memory_bank, memory_lengths), atol=1e-5)

    # --- default (bf16 matmul) path, masked: compare vs bf16-rounded ref ---
    src_r = source.astype(jnp.bfloat16).astype(jnp.float32)
    mem_r = memory_bank.astype(jnp.bfloat16).astype(jnp.float32)
    out_bf = jax.block_until_ready(
        paragraph_plan_selection_attention(source, memory_bank, memory_lengths))
    check(out_bf, _reference(src_r, mem_r, memory_lengths), atol=1e-4)

    # --- no-mask path (default bf16 matmul) ---
    out_nm = jax.block_until_ready(
        paragraph_plan_selection_attention(source, memory_bank, None))
    check(out_nm, _reference(src_r, mem_r, None), atol=1e-4)

    print("KERNEL_OK")
</pallas_src>

<mosaic_0001>
module attributes {stable_mosaic.version = 11 : i64} {
  func.func @_attn_kernel(%arg0: i32, %arg1: i32, %arg2: memref<2x8x32xf32, #tpu.memory_space<vmem>>, %arg3: memref<2x16x32xf32, #tpu.memory_space<vmem>>, %arg4: memref<2x1x16xf32, #tpu.memory_space<vmem>>, %arg5: memref<2x8x16xf32, #tpu.memory_space<vmem>>) attributes {dimension_semantics = [#tpu.dimension_semantics<arbitrary>, #tpu.dimension_semantics<parallel>], iteration_bounds = array<i64: 1, 1>, scalar_prefetch = 0 : i64, scratch_operands = 0 : i64, tpu.core_type = #tpu.core_type<tc>, window_params = [{transform_indices = @transform_0, window_bounds = array<i64: 2, 8, 32>}, {transform_indices = @transform_1, window_bounds = array<i64: 2, 16, 32>}, {transform_indices = @transform_2, window_bounds = array<i64: 2, 1, 16>}, {transform_indices = @transform_3, window_bounds = array<i64: 2, 8, 16>}]} {
    %c0 = arith.constant 0 : index
    %c0_0 = arith.constant 0 : index
    %c0_1 = arith.constant 0 : index
    %0 = vector.load %arg2[%c0, %c0_0, %c0_1] : memref<2x8x32xf32, #tpu.memory_space<vmem>>, vector<2x8x32xf32>
    %c0_2 = arith.constant 0 : index
    %c0_3 = arith.constant 0 : index
    %c0_4 = arith.constant 0 : index
    %1 = vector.load %arg3[%c0_2, %c0_3, %c0_4] : memref<2x16x32xf32, #tpu.memory_space<vmem>>, vector<2x16x32xf32>
    %cst = arith.constant dense<0.000000e+00> : vector<2x8x16xf32>
    %2 = tpu.matmul %0, %1, %cst {dimension_numbers = #tpu.dot_dimension_numbers<[2], [2], [1], [1], [0, 0, 0, 1, 1, 1], [0], [0]>} : vector<2x8x32xf32>, vector<2x16x32xf32>, vector<2x8x16xf32> -> vector<2x8x16xf32>
    %c0_5 = arith.constant 0 : index
    %c0_6 = arith.constant 0 : index
    %c0_7 = arith.constant 0 : index
    %3 = vector.load %arg4[%c0_5, %c0_6, %c0_7] : memref<2x1x16xf32, #tpu.memory_space<vmem>>, vector<2x1x16xf32>
    %4 = vector.broadcast %3 : vector<2x1x16xf32> to vector<2x8x16xf32>
    %5 = arith.addf %2, %4 : vector<2x8x16xf32>
    %cst_8 = arith.constant dense<0xFF800000> : vector<2x8xf32>
    %6 = vector.multi_reduction <maximumf>, %5, %cst_8 [2] : vector<2x8x16xf32> to vector<2x8xf32>
    %7 = vector.shape_cast %6 : vector<2x8xf32> to vector<2x8x1xf32>
    %8 = vector.broadcast %7 : vector<2x8x1xf32> to vector<2x8x16xf32>
    %9 = arith.subf %5, %8 : vector<2x8x16xf32>
    %10 = math.exp %9 : vector<2x8x16xf32>
    %cst_9 = arith.constant dense<0.000000e+00> : vector<2x8xf32>
    %11 = vector.multi_reduction <add>, %10, %cst_9 [2] : vector<2x8x16xf32> to vector<2x8xf32>
    %12 = vector.shape_cast %11 : vector<2x8xf32> to vector<2x8x1xf32>
    %13 = math.log %12 : vector<2x8x1xf32>
    %14 = arith.addf %7, %13 : vector<2x8x1xf32>
    %15 = vector.broadcast %14 : vector<2x8x1xf32> to vector<2x8x16xf32>
    %16 = arith.subf %5, %15 : vector<2x8x16xf32>
    %c0_10 = arith.constant 0 : index
    %c0_11 = arith.constant 0 : index
    %c0_12 = arith.constant 0 : index
    %17 = vector.load %arg5[%c0_10, %c0_11, %c0_12] : memref<2x8x16xf32, #tpu.memory_space<vmem>>, vector<2x8x16xf32>
    tpu.vector_store %arg5[%c0_10, %c0_11, %c0_12], %16 {strides = array<i32>} : memref<2x8x16xf32, #tpu.memory_space<vmem>>, vector<2x8x16xf32>,
    return
  }
  func.func @transform_0(%arg0: i32, %arg1: i32) -> (i32, i32, i32) {
    %c0_i32 = arith.constant 0 : i32
    %c0_i32_0 = arith.constant 0 : i32
    return %arg0, %arg1, %c0_i32 : i32, i32, i32
  }
  func.func @transform_1(%arg0: i32, %arg1: i32) -> (i32, i32, i32) {
    %c0_i32 = arith.constant 0 : i32
    %c0_i32_0 = arith.constant 0 : i32
    %c0_i32_1 = arith.constant 0 : i32
    return %arg0, %c0_i32, %c0_i32_0 : i32, i32, i32
  }
  func.func @transform_2(%arg0: i32, %arg1: i32) -> (i32, i32, i32) {
    %c0_i32 = arith.constant 0 : i32
    %c0_i32_0 = arith.constant 0 : i32
    %c0_i32_1 = arith.constant 0 : i32
    return %arg0, %c0_i32, %c0_i32_0 : i32, i32, i32
  }
  func.func @transform_3(%arg0: i32, %arg1: i32) -> (i32, i32, i32) {
    %c0_i32 = arith.constant 0 : i32
    %c0_i32_0 = arith.constant 0 : i32
    return %arg0, %arg1, %c0_i32 : i32, i32, i32
  }
}

</mosaic_0001>

<bundles_post_ra>
// kernel: tpu_custom_call.1
= control target key start
LH: loop header
LB: loop body
LE: loop exit
PB: predicated region body
PF: predicated region fallthrough
CT: control target
= control target key end

     0   :  { %8 = vsyncpa [#allocation3], 0  ;;  %s478_s0 = inlined_call_operand.hbm [shape: f32[2,8,32], index: 0, kind: input, shape index: {}]   ;;  %s479_s1 = inlined_call_operand.hbm [shape: f32[2,16,32], index: 1, kind: input, shape index: {}]   ;;  %s480_s2 = inlined_call_operand.vmem [shape: f32[2,1,16], index: 2, kind: input, shape index: {}]   ;;  %s481_s3 = inlined_call_operand.hbm [shape: f32[2,8,16], index: 3, kind: output, shape index: {}]  }
   0x1   :  { %9 = vsyncpa [#allocation6], 0 }
   0x2   :  { %10 = vsyncpa [#allocation4], 0  ;;  %s393_s12 = smov [#allocation2]   ;;  %s321_s16 = scalar_lea.hbm %s478_s0, 256 }
   0x3   :  { %s16_s13 = sshll.u32 %s393_s12, 4  ;;  %p322_p0 = scmp.ne.s32.totalorder %s478_s0, %s321_s16  ;;  %s17_s13 = int_to_ptr.vmem [resolvable:$true] %s16_s13 }
   0x4   :  { %p325_p1 = scmp.lt.u32.totalorder %s321_s16, %s478_s0 }
   0x6   :  { %p327_p2 = pnand %p325_p1, %p322_p0 }
   0x8   :  { %330 = shalt.err (!%p327_p2)
}
   0x9   :  { %s331_s21 = scalar_lea.vmem %s17_s13, 256  ;;  %p336_p4 = scmp.lt.s32.totalorder %s17_s13, %s17_s13 }
   0xa   :  { %p332_p3 = scmp.ne.s32.totalorder %s17_s13, %s331_s21  ;;  %p337_p5 = scmp.lt.s32.totalorder %s331_s21, %s331_s21 }
   0xc   :  { %p338_p6 = por %p337_p5, %p336_p4 }
   0xe   :  { %p339_p7 = pnand %p338_p6, %p332_p3 }
  0x10   :  { %342 = shalt.err (!%p339_p7)
}
  0x11   :  { %s394_s22 = smov 128   ;;  %s395_s23 = smov 8  }
  0x12   :  { %22 = dma.hbm_to_vmem [thread:$0]  %s478_s0, 256, %s17_s13, [#allocation3], %s394_s22, %s394_s22, %s395_s23  }
  0x13   :  { %s396_s26 = smov [#allocation5]   ;;  %s343_s30 = scalar_lea.hbm %s479_s1, 512 }
  0x14   :  { %s28_s27 = sshll.u32 %s396_s26, 4  ;;  %p344_p8 = scmp.ne.s32.totalorder %s479_s1, %s343_s30  ;;  %s29_s27 = int_to_ptr.vmem [resolvable:$true] %s28_s27 }
  0x15   :  { %p347_p9 = scmp.lt.u32.totalorder %s343_s30, %s479_s1 }
  0x17   :  { %p349_p10 = pnand %p347_p9, %p344_p8 }
  0x19   :  { %352 = shalt.err (!%p349_p10)
}
  0x1a   :  { %s353_s8 = scalar_lea.vmem %s29_s27, 512  ;;  %p358_p12 = scmp.lt.s32.totalorder %s29_s27, %s29_s27 }
  0x1b   :  { %p354_p11 = scmp.ne.s32.totalorder %s29_s27, %s353_s8  ;;  %p359_p13 = scmp.lt.s32.totalorder %s353_s8, %s353_s8 }
  0x1d   :  { %p360_p0 = por %p359_p13, %p358_p12 }
  0x1f   :  { %p361_p1 = pnand %p360_p0, %p354_p11 }
  0x21   :  { %364 = shalt.err (!%p361_p1)
}
  0x22   :  { %34 = dma.hbm_to_vmem [thread:$0]  %s479_s1, 512, %s29_s27, [#allocation6], %s394_s22, %s394_s22, %s395_s23  }
  0x23   :  { %387 = dma.done.wait [#allocation3], 256  }
  0x24   :  { %388 = vsyncadd [#allocation3], 4294967040 }
  0x25   :  { %389 = dma.done.wait [#allocation6], 512  }
  0x26   :  { %390 = vsyncadd [#allocation6], 4294966784  ;;  %v397_v0 = vmov 0.0|0.0   ;;  %vm398_vm0 = vmmov 0   ;;  %v399_v1 = vmov 0.0   ;;  %vm63_vm1 = vcmask 261120  }
  0x27   :  { %297 = vmatprep.subr.bf16.mxu0 %v397_v0  ;;  %301 = vmatprep.subr.bf16.mxu1 %v397_v0  ;;  %vm299_vm2 = vmpackc.low %vm63_vm1, %vm63_vm1  ;;  %v45_v2 = vld [vmem:[#allocation5] sm:$0xff]  ;;  %v46_v3 = vld [vmem:[#allocation5 + $0x8] sm:$0xff]  ;;  %vm222_vm3 = vcmask 130048  }
  0x28   :  { %287 = vmatprep.mubr.msk.f32.mxu0 %vm398_vm0, %v399_v1  ;;  %294 = vmatprep.mubr.msk.f32.mxu1 %vm398_vm0, %v399_v1  ;;  %v47_v4 = vld [vmem:[#allocation5 + $0x10] sm:$0xff]  ;;  %v298_v5 = vpack.c.bf16 %v46_v3, %v45_v2  ;;  %v48_v6 = vld [vmem:[#allocation5 + $0x18] sm:$0xff] }
  0x29   :  { %v302_v7 = vpack.c.bf16 %v48_v6, %v47_v4  ;;  %v43_v8 = vld [vmem:[#allocation2] sm:$0xff]  ;;  %v44_v9 = vld [vmem:[#allocation2 + $0x8] sm:$0xff] }
  0x2a   :  { %300 = vmatpush3.bf16.xpose.msk.msra.mxu0 %vm299_vm2, %v298_v5  ;;  %v269_v10 = vld [vmem:[%s480_s2] ss:$0 sm:$0xff]  ;;  %v270_v11 = vld [vmem:[%s480_s2 + $0x1] ss:$0 sm:$0xff]  ;;  %s400_s2 = smov [#allocation7]  }
  0x2b   :  { %304 = vmatpush3.bf16.xpose.msk.msra.mxu1 %vm299_vm2, %v302_v7  ;;  %s256_s13 = sshll.u32 %s400_s2, 4  ;;  %s257_s13 = int_to_ptr.vmem [resolvable:$true] %s256_s13 }
  0x2c   :  { %s365_s14 = scalar_lea.vmem %s257_s13, 256  ;;  %p370_p3 = scmp.lt.s32.totalorder %s257_s13, %s257_s13 }
  0x2d   :  { %p366_p2 = scmp.ne.s32.totalorder %s257_s13, %s365_s14  ;;  %p371_p4 = scmp.lt.s32.totalorder %s365_s14, %s365_s14 }
  0x2f   :  { %p372_p5 = por %p371_p4, %p370_p3 }
  0x31   :  { %288 = vmatmul.mubr.msk.f32.vlgmr.msra.gmra.mrb[0].mxu0 %vm63_vm1, %v43_v8  ;;  %p373_p6 = pnand %p372_p5, %p366_p2 }
  0x32   :  { %295 = vmatmul.mubr.msk.f32.vlgmr.msra.gmra.mrb[0].mxu1 %vm63_vm1, %v44_v9 }
 0x104   :  { %v139_v12 = vpop.f32.mrb[0].mxu0 }
 0x105   :  { %v140_v13 = vadd.f32 %v269_v10, %v139_v12  ;;  %v289_v14 = vpop.f32.mrb[1].mxu0  ;;  %v218_v15 = vpop.f32.mrb[0].mxu1 }
 0x106   :  { %v219_v16 = vadd.f32 %v270_v11, %v218_v15  ;;  %v296_v17 = vpop.f32.mrb[1].mxu1 }
 0x107   :  { %v223_v18 = vsel %vm222_vm3, %v140_v13, -inf }
 0x108   :  { %224 = vmax.xlane.f32.xlu0 %v223_v18  ;;  %v226_v19 = vsel %vm222_vm3, %v219_v16, -inf }
 0x10c   :  { %227 = vmax.xlane.f32.xlu0 %v226_v19 }
 0x195   :  { %v225_v20 = vpop.xlane.xlu0 %224 }
 0x196   :  { %v229_v21 = vsub.f32 %v140_v13, %v225_v20 }
 0x198   :  { %v231_v22 = vmul.f32 1.442695, %v229_v21 }
 0x199   :  { %v228_v23 = vpop.xlane.xlu0 %227 }
 0x19a   :  { %313 = vpow2.f32 %v231_v22  ;;  %v230_v24 = vsub.f32 %v219_v16, %v228_v23 }
 0x19c   :  { %v233_v25 = vmul.f32 1.442695, %v230_v24 }
 0x19e   :  { %315 = vpow2.f32 %v233_v25 }
 0x1a4   :  { %v314_v26 = vpop.eup %313 }
 0x1a5   :  { %v235_v27 = vsel %vm222_vm3, %v314_v26, 0.0 }
 0x1a6   :  { %236 = vadd.xlane.f32.xlu1 %v235_v27 }
 0x1a8   :  { %v316_v28 = vpop.eup %315 }
 0x1a9   :  { %v238_v29 = vsel %vm222_vm3, %v316_v28, 0.0 }
 0x1aa   :  { %239 = vadd.xlane.f32.xlu1 %v238_v29 }
 0x233   :  { %v237_v30 = vpop.xlane.xlu1 %236 }
 0x234   :  { %317 = vlog2.f32 %v237_v30 }
 0x237   :  { %v240_v31 = vpop.xlane.xlu1 %239 }
 0x238   :  { %319 = vlog2.f32 %v240_v31 }
 0x23e   :  { %v318_v32 = vpop.eup %317 }
 0x23f   :  { %v242_v33 = vmul.f32 0.6931472, %v318_v32 }
 0x241   :  { %v245_v34 = vadd.f32 %v242_v33, %v225_v20 }
 0x242   :  { %v320_v35 = vpop.eup %319 }
 0x243   :  { %v247_v36 = vsub.f32 %v140_v13, %v245_v34  ;;  %v244_v37 = vmul.f32 0.6931472, %v320_v35 }
 0x245   :  { %249 = vst.msk [vmem:[#allocation7] sm:$0xff] %vm222_vm3, %v247_v36  ;;  %v246_v38 = vadd.f32 %v244_v37, %v228_v23 }
 0x247   :  { %v248_v39 = vsub.f32 %v219_v16, %v246_v38 }
 0x249   :  { %250 = vst.msk [vmem:[#allocation7 + $0x8] sm:$0xff] %vm222_vm3, %v248_v39 }
 0x24a   :  { %376 = shalt.err (!%p373_p6)
}
 0x24b   :  { %s377_s17 = scalar_lea.hbm %s481_s3, 256 }
 0x24c   :  { %p378_p7 = scmp.ne.s32.totalorder %s481_s3, %s377_s17  ;;  %p381_p8 = scmp.lt.u32.totalorder %s377_s17, %s481_s3 }
 0x24e   :  { %p383_p9 = pnand %p381_p8, %p378_p7 }
 0x250   :  { %386 = shalt.err (!%p383_p9)
}
 0x251   :  { %262 = dma.vmem_to_hbm [thread:$0]  %s257_s13, 256, %s481_s3, [#allocation4], %s394_s22, %s394_s22, %s395_s23  }
 0x252   :  { %391 = dma.done.wait [#allocation4], 256  }
 0x253   :  { %392 = vsyncadd [#allocation4], 4294967040 }
 0x254   :  { %266 = vsyncpa [#allocation3], 1 }
 0x255   :  { %267 = vsyncpa [#allocation6], 1 }
 0x256   :  { %268 = vsyncpa [#allocation4], 1 }

</bundles_post_ra>
